<compile_context>
chip_gen: v7x
topology: tpu7x:2x2x1
jax: 0.10.0
libtpu: 0.0.40
codegen_flags: <defaults>
</compile_context>

<pallas_src>
import functools

import jax
import jax.numpy as jnp
from jax.experimental import pallas as pl
from jax.experimental.pallas import tpu as pltpu


def _round_up(x, m):
    return ((x + m - 1) // m) * m


def _dqn_kernel(fc1, fc2, n_actions, x_ref, w1_ref, w2_ref, w3_ref, b_ref, out_ref):
    """One batch tile.

    x_ref : (tile_b, input_dim) f32   state tile straight from HBM (batch on sublanes)
    wK    : (out, in)           bf16  PyTorch layout, VMEM-resident across the grid
    b_ref : (fc1+fc2+na, 1)     f32   all three biases concatenated (resident)
    out   : (n_actions, tile_b) f32   batch on lanes -> lane-dense unmasked stores
    Matmuls: bf16 x bf16 operands, f32 MXU accumulation; bias/ReLU in f32 on the VPU.
    """
    # Cast + flip to batch-on-lanes inside the kernel (otherwise-idle VPU/XLU slots).
    x = x_ref[...].astype(jnp.bfloat16)                                 # (tile_b, in)

    b1 = b_ref[0:fc1, :]                                                # (fc1, 1) f32
    b2 = b_ref[fc1:fc1 + fc2, :]                                        # (fc2, 1) f32
    b3 = b_ref[fc1 + fc2:fc1 + fc2 + n_actions, :]                      # (na, 1)  f32

    # fc1: (fc1, in) x (in, tile_b) -> (fc1, tile_b), f32 accumulation.
    h1 = jnp.dot(w1_ref[...], x.T, preferred_element_type=jnp.float32) + b1
    h1 = jnp.maximum(h1, 0.0)

    # fc2
    h2 = jnp.dot(w2_ref[...], h1.astype(jnp.bfloat16),
                 preferred_element_type=jnp.float32) + b2
    h2 = jnp.maximum(h2, 0.0)

    # fc3 (Q-values, no activation)
    out = jnp.dot(w3_ref[...], h2.astype(jnp.bfloat16),
                  preferred_element_type=jnp.float32) + b3
    out_ref[...] = out.astype(out_ref.dtype)                            # (na, tile_b)


def deep_q_network_forward(state, prepared, *, block_b=512):
    """state: (B, input_dim) f32. prepared: output of prepare_dqn_params.

    Returns (B, n_actions) f32 Q-values — same math as the nn.Module forward, with the
    three matmuls run as bf16-operand / f32-accumulate.
    """
    w1, w2, w3, b_all = prepared["w1"], prepared["w2"], prepared["w3"], prepared["b_all"]
    B, input_dim = state.shape
    fc1, fc2, n_actions = w1.shape[0], w2.shape[0], w3.shape[0]

    # --- batch tiling -------------------------------------------------------------
    # Batch sits on the lane axis of every intermediate/output tile, so tiles are
    # multiples of 128. Single tile when B fits; otherwise an EVEN number of tiles so
    # v7x's two TensorCores get equal work under dimension_semantics=("parallel",).
    cap = max(128, _round_up(int(block_b), 128))
    b128 = _round_up(B, 128)
    if b128 <= cap:
        tile_b, num_tiles = b128, 1
    else:
        num_tiles = pl.cdiv(b128, cap)
        if num_tiles % 2:
            num_tiles += 1
        tile_b = _round_up(pl.cdiv(b128, num_tiles), 128)
    b_pad = tile_b * num_tiles

    kernel = functools.partial(_dqn_kernel, fc1, fc2, n_actions)

    # Constant index_map -> block index never changes -> stays resident in VMEM.
    resident = lambda a: pl.BlockSpec(a.shape, lambda i: (0, 0))

    out_t = pl.pallas_call(
        kernel,
        out_shape=jax.ShapeDtypeStruct((n_actions, b_pad), jnp.float32),
        grid=(num_tiles,),
        in_specs=[
            # State tile straight from HBM; boundary blocks handle B % tile_b != 0
            # (out-of-range rows only ever feed padded output columns).
            pl.BlockSpec((tile_b, input_dim), lambda i: (i, 0)),
            resident(w1), resident(w2), resident(w3), resident(b_all),
        ],
        out_specs=pl.BlockSpec((n_actions, tile_b), lambda i: (0, i)),
        compiler_params=pltpu.CompilerParams(
            dimension_semantics=("parallel",),   # megacore-shard batch tiles on v7x
        ),
    )(state, w1, w2, w3, b_all)

    return out_t[:, :B].T


def prepare_dqn_params(params):
    """One-time conversion: bf16 weights (torch layout) + concatenated f32 bias column."""
    b_all = jnp.concatenate(
        [params["b1"], params["b2"], params["b3"]]).astype(jnp.float32).reshape(-1, 1)
    return {
        "w1": params["w1"].astype(jnp.bfloat16),
        "w2": params["w2"].astype(jnp.bfloat16),
        "w3": params["w3"].astype(jnp.bfloat16),
        "b_all": b_all,
    }


def init_dqn_params(key, input_dim, fc1_dims, fc2_dims, n_actions):
    """PyTorch nn.Linear-style init: U(-1/sqrt(fan_in), 1/sqrt(fan_in)), torch layout (out, in)."""
    ks = jax.random.split(key, 6)

    def linear(kw, kb, fan_in, fan_out):
        bound = 1.0 / float(fan_in) ** 0.5
        w = jax.random.uniform(kw, (fan_out, fan_in), jnp.float32, -bound, bound)
        b = jax.random.uniform(kb, (fan_out,), jnp.float32, -bound, bound)
        return w, b

    w1, b1 = linear(ks[0], ks[1], input_dim, fc1_dims)
    w2, b2 = linear(ks[2], ks[3], fc1_dims, fc2_dims)
    w3, b3 = linear(ks[4], ks[5], fc2_dims, n_actions)
    return {"w1": w1, "b1": b1, "w2": w2, "b2": b2, "w3": w3, "b3": b3}


def ref_forward_f32(state, params):
    h1 = jnp.maximum(state @ params["w1"].T + params["b1"], 0.0)
    h2 = jnp.maximum(h1 @ params["w2"].T + params["b2"], 0.0)
    return h2 @ params["w3"].T + params["b3"]


def ref_forward_bf16(state, params):
    """Same bf16-operand / f32-accumulate contract as the kernel, in plain JAX."""
    bf, f32 = jnp.bfloat16, jnp.float32
    h1 = jnp.dot(state.astype(bf), params["w1"].T.astype(bf),
                 preferred_element_type=f32) + params["b1"]
    h1 = jnp.maximum(h1, 0.0)
    h2 = jnp.dot(h1.astype(bf), params["w2"].T.astype(bf),
                 preferred_element_type=f32) + params["b2"]
    h2 = jnp.maximum(h2, 0.0)
    return jnp.dot(h2.astype(bf), params["w3"].T.astype(bf),
                   preferred_element_type=f32) + params["b3"]


# TODO(synk): optimizer (Adam), MSELoss and device plumbing from the nn.Module are
# training-side machinery, not part of the forward pass, and are not implemented here.

if __name__ == "__main__":
    key = jax.random.PRNGKey(0)
    k_params, k_s1, k_s2, k_s3 = jax.random.split(key, 4)

    # Shapes consistent with the module: input_dims=(16,), fc1=32, fc2=32, n_actions=8.
    input_dim, fc1_dims, fc2_dims, n_actions = 16, 32, 32, 8
    params = init_dqn_params(k_params, input_dim, fc1_dims, fc2_dims, n_actions)
    prepared = prepare_dqn_params(params)      # weight cast / bias concat hoisted out

    fwd = jax.jit(deep_q_network_forward)

    # Three runs: tiny batch (single padded tile), a non-multiple-of-128 batch (single
    # larger tile + boundary read), and a batch that needs two tiles (even split for
    # v7x megacore + resident-weight pipelining).
    for k_state, batch in ((k_s1, 2), (k_s2, 260), (k_s3, 600)):
        state = jax.random.normal(k_state, (batch, input_dim), jnp.float32)

        actions = jax.block_until_ready(fwd(state, prepared))
        assert actions.shape == (batch, n_actions)

        # Exact contract check: bf16-operand / f32-accumulate forward.
        ref_bf16 = ref_forward_bf16(state, params)
        assert jnp.allclose(actions, ref_bf16, atol=5e-3, rtol=5e-3), (
            "bf16-ref mismatch", batch, float(jnp.max(jnp.abs(actions - ref_bf16))))

        # Sanity check vs the full-f32 PyTorch forward (loose: bf16 operand rounding).
        ref_f32 = ref_forward_f32(state, params)
        assert jnp.allclose(actions, ref_f32, atol=5e-2, rtol=5e-2), (
            "f32-ref mismatch", batch, float(jnp.max(jnp.abs(actions - ref_f32))))

        # No NaN/inf leakage from boundary-block garbage into valid columns.
        assert bool(jnp.all(jnp.isfinite(actions)))

    print("KERNEL_OK")
</pallas_src>

<mosaic_0001>
module attributes {stable_mosaic.version = 11 : i64} {
  func.func @_dqn_kernel(%arg0: i32, %arg1: memref<128x16xf32, #tpu.memory_space<vmem>>, %arg2: memref<32x16xbf16, #tpu.memory_space<vmem>>, %arg3: memref<32x32xbf16, #tpu.memory_space<vmem>>, %arg4: memref<8x32xbf16, #tpu.memory_space<vmem>>, %arg5: memref<72x1xf32, #tpu.memory_space<vmem>>, %arg6: memref<8x128xf32, #tpu.memory_space<vmem>>) attributes {dimension_semantics = [#tpu.dimension_semantics<parallel>], iteration_bounds = array<i64: 1>, scalar_prefetch = 0 : i64, scratch_operands = 0 : i64, tpu.core_type = #tpu.core_type<tc>, window_params = [{transform_indices = @transform_0, window_bounds = array<i64: 128, 16>}, {pipeline_mode = #tpu.pipeline_mode<synchronous>, transform_indices = @transform_1, window_bounds = array<i64: 32, 16>}, {pipeline_mode = #tpu.pipeline_mode<synchronous>, transform_indices = @transform_2, window_bounds = array<i64: 32, 32>}, {pipeline_mode = #tpu.pipeline_mode<synchronous>, transform_indices = @transform_3, window_bounds = array<i64: 8, 32>}, {pipeline_mode = #tpu.pipeline_mode<synchronous>, transform_indices = @transform_4, window_bounds = array<i64: 72, 1>}, {transform_indices = @transform_5, window_bounds = array<i64: 8, 128>}]} {
    %c0 = arith.constant 0 : index
    %c0_0 = arith.constant 0 : index
    %0 = vector.load %arg1[%c0, %c0_0] : memref<128x16xf32, #tpu.memory_space<vmem>>, vector<128x16xf32>
    %1 = arith.truncf %0 : vector<128x16xf32> to vector<128x16xbf16>
    %c0_1 = arith.constant 0 : index
    %c0_2 = arith.constant 0 : index
    %2 = vector.load %arg5[%c0_1, %c0_2] : memref<72x1xf32, #tpu.memory_space<vmem>>, vector<32x1xf32>
    %c32 = arith.constant 32 : index
    %c0_3 = arith.constant 0 : index
    %3 = vector.load %arg5[%c32, %c0_3] : memref<72x1xf32, #tpu.memory_space<vmem>>, vector<32x1xf32>
    %c64 = arith.constant 64 : index
    %c0_4 = arith.constant 0 : index
    %4 = vector.load %arg5[%c64, %c0_4] : memref<72x1xf32, #tpu.memory_space<vmem>>, vector<8x1xf32>
    %c0_5 = arith.constant 0 : index
    %c0_6 = arith.constant 0 : index
    %5 = vector.load %arg2[%c0_5, %c0_6] : memref<32x16xbf16, #tpu.memory_space<vmem>>, vector<32x16xbf16>
    %6 = tpu.transpose %1, [1, 0] : vector<128x16xbf16> -> vector<16x128xbf16>
    %cst = arith.constant dense<0.000000e+00> : vector<32x128xf32>
    %7 = tpu.matmul %5, %6, %cst {dimension_numbers = #tpu.dot_dimension_numbers<[1], [0], [0], [1], [0, 0, 1, 1], [], []>} : vector<32x16xbf16>, vector<16x128xbf16>, vector<32x128xf32> -> vector<32x128xf32>
    %8 = vector.broadcast %2 : vector<32x1xf32> to vector<32x128xf32>
    %9 = arith.addf %7, %8 : vector<32x128xf32>
    %cst_7 = arith.constant 0.000000e+00 : f32
    %10 = vector.broadcast %cst_7 : f32 to vector<32x128xf32>
    %11 = arith.maximumf %9, %10 : vector<32x128xf32>
    %c0_8 = arith.constant 0 : index
    %c0_9 = arith.constant 0 : index
    %12 = vector.load %arg3[%c0_8, %c0_9] : memref<32x32xbf16, #tpu.memory_space<vmem>>, vector<32x32xbf16>
    %13 = arith.truncf %11 : vector<32x128xf32> to vector<32x128xbf16>
    %cst_10 = arith.constant dense<0.000000e+00> : vector<32x128xf32>
    %14 = tpu.matmul %12, %13, %cst_10 {dimension_numbers = #tpu.dot_dimension_numbers<[1], [0], [0], [1], [0, 0, 1, 1], [], []>} : vector<32x32xbf16>, vector<32x128xbf16>, vector<32x128xf32> -> vector<32x128xf32>
    %15 = vector.broadcast %3 : vector<32x1xf32> to vector<32x128xf32>
    %16 = arith.addf %14, %15 : vector<32x128xf32>
    %cst_11 = arith.constant 0.000000e+00 : f32
    %17 = vector.broadcast %cst_11 : f32 to vector<32x128xf32>
    %18 = arith.maximumf %16, %17 : vector<32x128xf32>
    %c0_12 = arith.constant 0 : index
    %c0_13 = arith.constant 0 : index
    %19 = vector.load %arg4[%c0_12, %c0_13] : memref<8x32xbf16, #tpu.memory_space<vmem>>, vector<8x32xbf16>
    %20 = arith.truncf %18 : vector<32x128xf32> to vector<32x128xbf16>
    %cst_14 = arith.constant dense<0.000000e+00> : vector<8x128xf32>
    %21 = tpu.matmul %19, %20, %cst_14 {dimension_numbers = #tpu.dot_dimension_numbers<[1], [0], [0], [1], [0, 0, 1, 1], [], []>} : vector<8x32xbf16>, vector<32x128xbf16>, vector<8x128xf32> -> vector<8x128xf32>
    %22 = vector.broadcast %4 : vector<8x1xf32> to vector<8x128xf32>
    %23 = arith.addf %21, %22 : vector<8x128xf32>
    %c0_15 = arith.constant 0 : index
    %c0_16 = arith.constant 0 : index
    %24 = vector.load %arg6[%c0_15, %c0_16] : memref<8x128xf32, #tpu.memory_space<vmem>>, vector<8x128xf32>
    tpu.vector_store %arg6[%c0_15, %c0_16], %23 {strides = array<i32>} : memref<8x128xf32, #tpu.memory_space<vmem>>, vector<8x128xf32>,
    return
  }
  func.func @transform_0(%arg0: i32) -> (i32, i32) {
    %c0_i32 = arith.constant 0 : i32
    %c0_i32_0 = arith.constant 0 : i32
    return %arg0, %c0_i32 : i32, i32
  }
  func.func @transform_1(%arg0: i32) -> (i32, i32) {
    %c0_i32 = arith.constant 0 : i32
    %c0_i32_0 = arith.constant 0 : i32
    %c0_i32_1 = arith.constant 0 : i32
    return %c0_i32, %c0_i32_0 : i32, i32
  }
  func.func @transform_2(%arg0: i32) -> (i32, i32) {
    %c0_i32 = arith.constant 0 : i32
    %c0_i32_0 = arith.constant 0 : i32
    %c0_i32_1 = arith.constant 0 : i32
    return %c0_i32, %c0_i32_0 : i32, i32
  }
  func.func @transform_3(%arg0: i32) -> (i32, i32) {
    %c0_i32 = arith.constant 0 : i32
    %c0_i32_0 = arith.constant 0 : i32
    %c0_i32_1 = arith.constant 0 : i32
    return %c0_i32, %c0_i32_0 : i32, i32
  }
  func.func @transform_4(%arg0: i32) -> (i32, i32) {
    %c0_i32 = arith.constant 0 : i32
    %c0_i32_0 = arith.constant 0 : i32
    %c0_i32_1 = arith.constant 0 : i32
    return %c0_i32, %c0_i32_0 : i32, i32
  }
  func.func @transform_5(%arg0: i32) -> (i32, i32) {
    %c0_i32 = arith.constant 0 : i32
    %c0_i32_0 = arith.constant 0 : i32
    return %c0_i32, %arg0 : i32, i32
  }
}

</mosaic_0001>

<bundles_post_ra>
// kernel: deep_q_network_forward.1
= control target key start
LH: loop header
LB: loop body
LE: loop exit
PB: predicated region body
PF: predicated region fallthrough
CT: control target
= control target key end

     0   :  { %vm88_vm0 = vcmask 130048   ;;  %v403_v3 = vmov 0   ;;  %vm208_vm1 = vcmask 261120   ;;  %vm405_vm2 = vmmov 0   ;;  %s550_s0 = inlined_call_operand.vmem [shape: f32[2,16], index: 0, kind: input, shape index: {}]   ;;  %s551_s1 = inlined_call_operand.vmem [shape: bf16[32,16], index: 1, kind: input, shape index: {}]   ;;  %s552_s4 = inlined_call_operand.vmem [shape: f32[72,1], index: 4, kind: input, shape index: {}]   ;;  %s553_s2 = inlined_call_operand.vmem [shape: bf16[32,32], index: 2, kind: input, shape index: {}]   ;;  %s554_s3 = inlined_call_operand.vmem [shape: bf16[8,32], index: 3, kind: input, shape index: {}]   ;;  %s555_s5 = inlined_call_operand.vmem [shape: f32[8,128], index: 5, kind: output, shape index: {}]  }
   0x1   :  { %v21_v0 = vld [vmem:[%s550_s0] sm:$0xff]  ;;  %v22_v1 = vld [vmem:[%s550_s0 + $0x8] sm:$0xff]  ;;  %v23_v2 = vld [vmem:[%s550_s0 + $0x10] sm:$0xff]  ;;  %397 = vset.pattern.permute.xlu0 %v403_v3  ;;  %398 = vset.pattern.permute.xlu1 %v403_v3 }
   0x2   :  { %v37_v4 = vpack.c.bf16 %v22_v1, %v21_v0  ;;  %v24_v5 = vld [vmem:[%s550_s0 + $0x18] sm:$0xff]  ;;  %v25_v8 = vld [vmem:[%s550_s0 + $0x20] sm:$0xff]  ;;  %v26_v9 = vld [vmem:[%s550_s0 + $0x28] sm:$0xff]  ;;  %v404_v0 = vmov 0.0  }
   0x3   :  { %v38_v6 = vpack.c.bf16 %v24_v5, %v23_v2  ;;  %v399_v10 = vld [vmem:[%s551_s1] sm:$0xff]   ;;  %v47_v12 = vld [vmem:[%s552_s4 + $0x10] sm:$0xff]  ;;  %v39_v14 = vpack.c.bf16 %v26_v9, %v25_v8  ;;  %v46_v15 = vld [vmem:[%s552_s4 + $0x8] sm:$0xff] }
   0x4   :  { %386 = vmatprep.subr.msk.bf16.mxu0 %vm88_vm0, %v37_v4  ;;  %v96_v7 = vsel %vm88_vm0, %v37_v4, 0  ;;  %v45_v11 = vld [vmem:[%s552_s4] sm:$0xff]  ;;  %366 = vmatprep.mubr.msk.bf16.mxu0 %vm88_vm0, %v399_v10  ;;  %v48_v16 = vld [vmem:[%s552_s4 + $0x18] sm:$0xff]  ;;  %v27_v18 = vld [vmem:[%s550_s0 + $0x30] sm:$0xff] }
   0x5   :  { %351 = vmatpush3.bf16.xpose.msra.mxu0 %v96_v7  ;;  %60 = vperm.xlu0 %397, %v45_v11   ;;  %v99_v13 = vsel %vm88_vm0, %v38_v6, 0  ;;  %v49_v17 = vld [vmem:[%s552_s4 + $0x20] sm:$0xff]  ;;  %v28_v19 = vld [vmem:[%s550_s0 + $0x38] sm:$0xff]  ;;  %v50_v20 = vld [vmem:[%s552_s4 + $0x28] sm:$0xff]  ;;  %v102_v21 = vsel %vm88_vm0, %v39_v14, 0 }
   0x6   :  { %387 = vmatprep.subr.msk.bf16.mxu0 %vm88_vm0, %v38_v6  ;;  %70 = vperm.xlu1 %398, %v47_v12   ;;  %v40_v22 = vpack.c.bf16 %v28_v19, %v27_v18  ;;  %v51_v23 = vld [vmem:[%s552_s4 + $0x30] sm:$0xff]  ;;  %v52_v24 = vld [vmem:[%s552_s4 + $0x38] sm:$0xff]  ;;  %v53_v25 = vld [vmem:[%s552_s4 + $0x40] sm:$0xff] }
   0x7   :  { %v29_v26 = vld [vmem:[%s550_s0 + $0x40] sm:$0xff]  ;;  %v30_v27 = vld [vmem:[%s550_s0 + $0x48] sm:$0xff]  ;;  %v31_v30 = vld [vmem:[%s550_s0 + $0x50] sm:$0xff] }
   0x8   :  { %v105_v28 = vsel %vm88_vm0, %v40_v22, 0  ;;  %v41_v29 = vpack.c.bf16 %v30_v27, %v29_v26  ;;  %v32_v31 = vld [vmem:[%s550_s0 + $0x58] sm:$0xff]  ;;  %v33_v34 = vld [vmem:[%s550_s0 + $0x60] sm:$0xff]  ;;  %v34_v35 = vld [vmem:[%s550_s0 + $0x68] sm:$0xff] }
   0x9   :  { %65 = vperm.xlu0 %397, %v46_v15   ;;  %v42_v33 = vpack.c.bf16 %v32_v31, %v31_v30  ;;  %v43_v37 = vpack.c.bf16 %v34_v35, %v33_v34  ;;  %v35_v38 = vld [vmem:[%s550_s0 + $0x70] sm:$0xff]  ;;  %v36_v39 = vld [vmem:[%s550_s0 + $0x78] sm:$0xff]  ;;  %v400_v43 = vld [vmem:[%s551_s1 + $0x8] sm:$0xff]  }
   0xa   :  { %75 = vperm.xlu1 %398, %v48_v16   ;;  %v108_v32 = vsel %vm88_vm0, %v41_v29, 0  ;;  %v44_v41 = vpack.c.bf16 %v36_v39, %v35_v38  ;;  %v401_v44 = vld [vmem:[%s553_s2] sm:$0xff]   ;;  %v402_v63 = vld [vmem:[%s553_s2 + $0x8] sm:$0xff]  }
   0xb   :  { %v111_v36 = vsel %vm88_vm0, %v42_v33, 0  ;;  %v114_v40 = vsel %vm88_vm0, %v43_v37, 0  ;;  %374 = vmatprep.mubr.msk.bf16.mxu1 %vm208_vm1, %v401_v44  ;;  %v268_v19 = vld [vmem:[%s554_s3] sm:$0xf] }
   0xc   :  { %v117_v42 = vsel %vm88_vm0, %v44_v41, 0 }
   0xd   :  { %353 = vmatpush3.bf16.xpose.msra.mxu0 %v99_v13  ;;  %180 = vperm.xlu0 %397, %v49_v17  }
   0xe   :  { %388 = vmatprep.subr.msk.bf16.mxu0 %vm88_vm0, %v39_v14  ;;  %185 = vperm.xlu1 %398, %v50_v20  }
  0x11   :  { %190 = vperm.xlu0 %397, %v51_v23  }
  0x12   :  { %195 = vperm.xlu1 %398, %v52_v24  }
  0x15   :  { %355 = vmatpush3.bf16.xpose.msra.mxu0 %v102_v21  ;;  %273 = vperm.xlu0 %397, %v53_v25  }
  0x16   :  { %389 = vmatprep.subr.msk.bf16.mxu0 %vm88_vm0, %v40_v22 }
  0x1d   :  { %357 = vmatpush3.bf16.xpose.msra.mxu0 %v105_v28 }
  0x1e   :  { %390 = vmatprep.subr.msk.bf16.mxu0 %vm88_vm0, %v41_v29 }
  0x25   :  { %359 = vmatpush3.bf16.xpose.msra.mxu0 %v108_v32 }
  0x26   :  { %391 = vmatprep.subr.msk.bf16.mxu0 %vm88_vm0, %v42_v33 }
  0x2d   :  { %361 = vmatpush3.bf16.xpose.msra.mxu0 %v111_v36 }
  0x2e   :  { %392 = vmatprep.subr.msk.bf16.mxu0 %vm88_vm0, %v43_v37 }
  0x35   :  { %363 = vmatpush3.bf16.xpose.msra.mxu0 %v114_v40 }
  0x36   :  { %393 = vmatprep.subr.msk.bf16.mxu0 %vm88_vm0, %v44_v41 }
  0x3d   :  { %365 = vmatpush3.bf16.xpose.msra.mxu0 %v117_v42 }
  0x44   :  { %367 = vmatmul.mubr.msk.bf16.vlgmr.msra.gmra.mrb[0].mxu0 %vm88_vm0, %v400_v43 }
  0x84   :  { %v61_v46 = vpop.permute.xlu0 %60 }
  0x85   :  { %v71_v45 = vpop.permute.xlu1 %70 }
  0x88   :  { %v66_v53 = vpop.permute.xlu0 %65 }
  0x89   :  { %v76_v50 = vpop.permute.xlu1 %75 }
  0x8c   :  { %v181_v1 = vpop.permute.xlu0 %180 }
  0x8d   :  { %v186_v2 = vpop.permute.xlu1 %185 }
  0x90   :  { %v191_v3 = vpop.permute.xlu0 %190 }
  0x91   :  { %v196_v7 = vpop.permute.xlu1 %195 }
  0x94   :  { %v274_v20 = vpop.permute.xlu0 %273 }
 0x117   :  { %v368_v47 = vpop.f32.mrb[0].mxu0 }
 0x118   :  { %v162_v48 = vadd.f32 %v368_v47, %v71_v45  ;;  %v153_v49 = vpop.f32.mrb[1].mxu0 }
 0x119   :  { %v154_v51 = vadd.f32 %v153_v49, %v61_v46  ;;  %v369_v52 = vpop.f32.mrb[2].mxu0 }
 0x11a   :  { %v165_v54 = vadd.f32 %v369_v52, %v76_v50  ;;  %v156_v55 = vpop.f32.mrb[3].mxu0  ;;  %v170_v57 = vmax.f32 %v162_v48, 0.0 }
 0x11b   :  { %v157_v56 = vadd.f32 %v156_v55, %v66_v53  ;;  %v168_v59 = vmax.f32 %v154_v51, 0.0 }
 0x11c   :  { %v171_v58 = vmax.f32 %v165_v54, 0.0 }
 0x11d   :  { %v169_v60 = vmax.f32 %v157_v56, 0.0 }
 0x11e   :  { %v177_v61 = vpack.c.bf16 %v171_v58, %v170_v57 }
 0x11f   :  { %v176_v62 = vpack.c.bf16 %v169_v60, %v168_v59 }
 0x121   :  { %370 = vmatprep.subr.bf16.mxu1 %v176_v62 }
 0x122   :  { %371 = vmatpush3.bf16.msra.mxu1 %v176_v62 }
 0x123   :  { %372 = vmatprep.subr.bf16.mxu1 %v177_v61 }
 0x126   :  { %373 = vmatpush3.bf16.msra.mxu1 %v177_v61 }
 0x127   :  { %378 = vmatprep.subr.bf16.mxu1 %v404_v0 }
 0x129   :  { %375 = vmatmul.mubr.msk.bf16.vlgmr.msra.gmra.mrb[0].mxu1 %vm208_vm1, %v402_v63 }
 0x12a   :  { %382 = vmatprep.mubr.msk.bf16.mxu1 %vm405_vm2, %v404_v0 }
 0x1fc   :  { %v376_v4 = vpop.f32.mrb[0].mxu1 }
 0x1fd   :  { %v258_v5 = vadd.f32 %v376_v4, %v191_v3  ;;  %v249_v6 = vpop.f32.mrb[1].mxu1 }
 0x1fe   :  { %v250_v8 = vadd.f32 %v249_v6, %v181_v1  ;;  %v377_v9 = vpop.f32.mrb[2].mxu1 }
 0x1ff   :  { %v261_v10 = vadd.f32 %v377_v9, %v196_v7  ;;  %v252_v11 = vpop.f32.mrb[3].mxu1  ;;  %v266_v13 = vmax.f32 %v258_v5, 0.0 }
 0x200   :  { %v253_v12 = vadd.f32 %v252_v11, %v186_v2  ;;  %v264_v15 = vmax.f32 %v250_v8, 0.0 }
 0x201   :  { %v267_v14 = vmax.f32 %v261_v10, 0.0 }
 0x202   :  { %v265_v16 = vmax.f32 %v253_v12, 0.0 }
 0x203   :  { %v270_v17 = vpack.c.bf16 %v267_v14, %v266_v13 }
 0x204   :  { %v269_v18 = vpack.c.bf16 %v265_v16, %v264_v15 }
 0x206   :  { %379 = vmatpush3.bf16.msra.mxu1 %v269_v18 }
 0x207   :  { %380 = vmatprep.subr.bf16.mxu1 %v404_v0 }
 0x20a   :  { %381 = vmatpush3.bf16.msra.mxu1 %v270_v17 }
 0x20d   :  { %383 = vmatmul.mubr.msk.bf16.vlgmr.msra.gmra.mrb[4].mxu1 %vm208_vm1, %v268_v19 }
 0x2e0   :  { %v313_v21 = vpop.f32.mrb[4].mxu1 }
 0x2e1   :  { %v314_v22 = vadd.f32 %v313_v21, %v274_v20  ;;  %v384_v23 = vpop.f32.mrb[5].mxu1 }
 0x2e2   :  { %v316_v24 = vpop.f32.mrb[6].mxu1 }
 0x2e3   :  { %319 = vst [vmem:[%s555_s5] sm:$0xff] %v314_v22  ;;  %v385_v25 = vpop.f32.mrb[7].mxu1 }

</bundles_post_ra>
